<compile_context>
chip_gen: v6e
topology: v6e:2x2x1
jax: 0.10.0
libtpu: 0.0.40
codegen_flags: <defaults>
</compile_context>

<pallas_src>
from functools import partial

import jax
import jax.numpy as jnp
from jax.experimental import pallas as pl
from jax.experimental.pallas import tpu as pltpu

latent_size = 64

LANE = 128
SUBLANE = 8


def _round_up(n, m):
    return ((n + m - 1) // m) * m


def _cdiv(a, b):
    return -(-a // b)


def encoder_kernel(x_ref, w1_ref, b1_ref, w2_ref, b2_ref, wh_ref, bh_ref,
                   out_ref, *, latent):
    mxu_dtype = w1_ref.dtype          # bf16 MXU operands, f32 accumulate/elementwise
    x = x_ref[...].astype(mxu_dtype)

    # linear1 + relu  (bias add / relu in f32)
    h = jnp.dot(x, w1_ref[...], preferred_element_type=jnp.float32) + b1_ref[...]
    h = jnp.maximum(h, 0.0)

    # linear2 + relu
    h = jnp.dot(h.astype(mxu_dtype), w2_ref[...],
                preferred_element_type=jnp.float32) + b2_ref[...]
    h = jnp.maximum(h, 0.0)

    # fused head: [mu | log_sigma] in one lane-dense (tb, 128) matmul
    head = jnp.dot(h.astype(mxu_dtype), wh_ref[...],
                   preferred_element_type=jnp.float32) + bh_ref[...]

    # exp only on the log_sigma half (lanes >= latent); EUP op + VPU select.
    lane = jax.lax.broadcasted_iota(jnp.int32, head.shape, dimension=1)
    out_ref[...] = jnp.where(lane < latent, head, jnp.exp(head)).astype(out_ref.dtype)


def prepare_params(params, mxu_dtype=jnp.bfloat16):
    """One-time prep (hoisted out of the forward): pad H to 128 lanes, fuse the
    mu / log_sigma heads into one (H_pad, 2L) weight, cast MXU operands to bf16.
    The result is reused across every forward call."""
    D_in, H = params["w1"].shape
    L = params["w_mu"].shape[1]

    H_pad = _round_up(H, LANE)
    out_w = _round_up(2 * L, LANE)          # 2*64 = 128 -> already lane-dense

    f32 = jnp.float32
    # K of the first matmul (D_in) stays unpadded so x streams at native width.
    w1 = jnp.zeros((D_in, H_pad), f32).at[:, :H].set(params["w1"]).astype(mxu_dtype)
    b1 = jnp.zeros((1, H_pad), f32).at[:, :H].set(params["b1"])
    w2 = jnp.zeros((H_pad, H_pad), f32).at[:H, :H].set(params["w2"]).astype(mxu_dtype)
    b2 = jnp.zeros((1, H_pad), f32).at[:, :H].set(params["b2"])
    wh = (jnp.zeros((H_pad, out_w), f32)
          .at[:H, :L].set(params["w_mu"])
          .at[:H, L:2 * L].set(params["w_ls"])).astype(mxu_dtype)
    bh = (jnp.zeros((1, out_w), f32)
          .at[:, :L].set(params["b_mu"])
          .at[:, L:2 * L].set(params["b_ls"]))
    return dict(w1=w1, b1=b1, w2=w2, b2=b2, wh=wh, bh=bh)


def encoder_forward(x, prepped, *, latent=latent_size, tile_b=1024):
    """x: (B, D_in) float32. prepped: output of prepare_params (padded/fused)."""
    B, D_in = x.shape
    w1, b1, w2, b2, wh, bh = (prepped[k] for k in ("w1", "b1", "w2", "b2", "wh", "bh"))
    H_pad = w1.shape[1]
    out_w = wh.shape[1]

    # Batch tiling: multiple-of-8 tiles, last-tile waste bounded to <8 rows,
    # and >=2 grid steps whenever possible so v7x's two TensorCores both work.
    B_pad = _round_up(max(B, 1), SUBLANE)
    min_steps = 2 if B_pad >= 2 * SUBLANE else 1
    n_steps = max(_cdiv(B_pad, tile_b), min_steps)
    tb = _round_up(_cdiv(B_pad, n_steps), SUBLANE)
    n_steps = _cdiv(B_pad, tb)
    B_grid = n_steps * tb

    if B_grid != B:
        x = jnp.pad(x, ((0, B_grid - B), (0, 0)))

    def resident(shape):
        # Same block every grid step -> stays VMEM-resident across the grid.
        return pl.BlockSpec(shape, lambda i: (0, 0))

    w_bytes = (w1.size * w1.dtype.itemsize + w2.size * w2.dtype.itemsize
               + wh.size * wh.dtype.itemsize
               + 4 * (b1.size + b2.size + bh.size))
    flops = 2 * B_grid * (D_in * H_pad + H_pad * H_pad + H_pad * out_w)
    bytes_accessed = (x.dtype.itemsize * B_grid * D_in      # streamed input (unpadded K)
                      + 4 * B_grid * out_w                  # f32 output
                      + w_bytes)                            # resident params (bf16 weights)

    out = pl.pallas_call(
        partial(encoder_kernel, latent=latent),
        out_shape=jax.ShapeDtypeStruct((B_grid, out_w), jnp.float32),
        grid=(n_steps,),
        in_specs=[
            pl.BlockSpec((tb, D_in), lambda i: (i, 0)),   # x: batch-tiled, pipelined
            resident((D_in, H_pad)), resident((1, H_pad)),
            resident((H_pad, H_pad)), resident((1, H_pad)),
            resident((H_pad, out_w)), resident((1, out_w)),
        ],
        out_specs=pl.BlockSpec((tb, out_w), lambda i: (i, 0)),
        compiler_params=pltpu.CompilerParams(
            dimension_semantics=("parallel",)),
        cost_estimate=pl.CostEstimate(
            flops=flops,
            transcendentals=B_grid * out_w,
            bytes_accessed=bytes_accessed),
    )(x, w1, b1, w2, b2, wh, bh)

    mu = out[:B, :latent]
    sigma = out[:B, latent:2 * latent]     # exp already applied in-kernel
    return mu, sigma


def init_params(key, d_in, h, latent):
    # Deterministic synthetic init (PyTorch-like uniform fan-in scaling).
    ks = jax.random.split(key, 8)

    def lin(kw, kb, fan_in, fan_out):
        bound = 1.0 / jnp.sqrt(fan_in)
        # Stored as (in, out) == W.T relative to torch.nn.Linear.weight.
        w = jax.random.uniform(kw, (fan_in, fan_out), jnp.float32, -bound, bound)
        b = jax.random.uniform(kb, (1, fan_out), jnp.float32, -bound, bound)
        return w, b

    w1, b1 = lin(ks[0], ks[1], d_in, h)
    w2, b2 = lin(ks[2], ks[3], h, h)
    w_mu, b_mu = lin(ks[4], ks[5], h, latent)
    w_ls, b_ls = lin(ks[6], ks[7], h, latent)
    return dict(w1=w1, b1=b1, w2=w2, b2=b2,
                w_mu=w_mu, b_mu=b_mu, w_ls=w_ls, b_ls=b_ls)


def encoder_ref(x, p):
    h = jnp.maximum(x @ p["w1"] + p["b1"], 0.0)
    h = jnp.maximum(h @ p["w2"] + p["b2"], 0.0)
    mu = h @ p["w_mu"] + p["b_mu"]
    sigma = jnp.exp(h @ p["w_ls"] + p["b_ls"])
    return mu, sigma


if __name__ == "__main__":
    B, D_in, H = 16, 32, 32          # B=16 -> 2 grid steps (exercises megacore path)
    key = jax.random.PRNGKey(0)
    kx, kp = jax.random.split(key)

    x = jax.random.normal(kx, (B, D_in), dtype=jnp.float32)
    params = init_params(kp, D_in, H, latent_size)

    prepped = prepare_params(params)                 # one-time, hoisted prep
    jax.block_until_ready(prepped)

    fwd = jax.jit(encoder_forward)
    mu, sigma = fwd(x, prepped)
    jax.block_until_ready((mu, sigma))

    mu_r, sigma_r = encoder_ref(x, params)           # f32 reference
    assert mu.shape == (B, latent_size) and sigma.shape == (B, latent_size)
    # bf16 MXU operands (f32 accumulation) -> loosened tolerance vs f32 reference.
    assert jnp.allclose(mu, mu_r, atol=5e-2, rtol=5e-2)
    assert jnp.allclose(sigma, sigma_r, atol=5e-2, rtol=5e-2)
    assert bool(jnp.all(sigma > 0))

    # TODO(synk): torch.distributions.Normal object construction has no Pallas
    # equivalent; the kernel returns (mu, sigma) which fully parameterize it.
    print("KERNEL_OK")
</pallas_src>

<mosaic_0001>
module attributes {stable_mosaic.version = 11 : i64} {
  func.func @encoder_kernel(%arg0: i32, %arg1: memref<8x32xf32, #tpu.memory_space<vmem>>, %arg2: memref<32x128xbf16, #tpu.memory_space<vmem>>, %arg3: memref<1x128xf32, #tpu.memory_space<vmem>>, %arg4: memref<128x128xbf16, #tpu.memory_space<vmem>>, %arg5: memref<1x128xf32, #tpu.memory_space<vmem>>, %arg6: memref<128x128xbf16, #tpu.memory_space<vmem>>, %arg7: memref<1x128xf32, #tpu.memory_space<vmem>>, %arg8: memref<8x128xf32, #tpu.memory_space<vmem>>) attributes {dimension_semantics = [#tpu.dimension_semantics<parallel>], iteration_bounds = array<i64: 2>, scalar_prefetch = 0 : i64, scratch_operands = 0 : i64, tpu.core_type = #tpu.core_type<tc>, window_params = [{transform_indices = @transform_0, window_bounds = array<i64: 8, 32>}, {pipeline_mode = #tpu.pipeline_mode<synchronous>, transform_indices = @transform_1, window_bounds = array<i64: 32, 128>}, {pipeline_mode = #tpu.pipeline_mode<synchronous>, transform_indices = @transform_2, window_bounds = array<i64: 1, 128>}, {pipeline_mode = #tpu.pipeline_mode<synchronous>, transform_indices = @transform_3, window_bounds = array<i64: 128, 128>}, {pipeline_mode = #tpu.pipeline_mode<synchronous>, transform_indices = @transform_4, window_bounds = array<i64: 1, 128>}, {pipeline_mode = #tpu.pipeline_mode<synchronous>, transform_indices = @transform_5, window_bounds = array<i64: 128, 128>}, {pipeline_mode = #tpu.pipeline_mode<synchronous>, transform_indices = @transform_6, window_bounds = array<i64: 1, 128>}, {transform_indices = @transform_7, window_bounds = array<i64: 8, 128>}]} {
    %c0 = arith.constant 0 : index
    %c0_0 = arith.constant 0 : index
    %0 = vector.load %arg1[%c0, %c0_0] : memref<8x32xf32, #tpu.memory_space<vmem>>, vector<8x32xf32>
    %1 = arith.truncf %0 : vector<8x32xf32> to vector<8x32xbf16>
    %c0_1 = arith.constant 0 : index
    %c0_2 = arith.constant 0 : index
    %2 = vector.load %arg2[%c0_1, %c0_2] : memref<32x128xbf16, #tpu.memory_space<vmem>>, vector<32x128xbf16>
    %cst = arith.constant dense<0.000000e+00> : vector<8x128xf32>
    %3 = tpu.matmul %1, %2, %cst {dimension_numbers = #tpu.dot_dimension_numbers<[1], [0], [0], [1], [0, 0, 1, 1], [], []>} : vector<8x32xbf16>, vector<32x128xbf16>, vector<8x128xf32> -> vector<8x128xf32>
    %c0_3 = arith.constant 0 : index
    %c0_4 = arith.constant 0 : index
    %4 = vector.load %arg3[%c0_3, %c0_4] : memref<1x128xf32, #tpu.memory_space<vmem>>, vector<1x128xf32>
    %5 = vector.broadcast %4 : vector<1x128xf32> to vector<8x128xf32>
    %6 = arith.addf %3, %5 : vector<8x128xf32>
    %cst_5 = arith.constant 0.000000e+00 : f32
    %7 = vector.broadcast %cst_5 : f32 to vector<8x128xf32>
    %8 = arith.maximumf %6, %7 : vector<8x128xf32>
    %9 = arith.truncf %8 : vector<8x128xf32> to vector<8x128xbf16>
    %c0_6 = arith.constant 0 : index
    %c0_7 = arith.constant 0 : index
    %10 = vector.load %arg4[%c0_6, %c0_7] : memref<128x128xbf16, #tpu.memory_space<vmem>>, vector<128x128xbf16>
    %cst_8 = arith.constant dense<0.000000e+00> : vector<8x128xf32>
    %11 = tpu.matmul %9, %10, %cst_8 {dimension_numbers = #tpu.dot_dimension_numbers<[1], [0], [0], [1], [0, 0, 1, 1], [], []>} : vector<8x128xbf16>, vector<128x128xbf16>, vector<8x128xf32> -> vector<8x128xf32>
    %c0_9 = arith.constant 0 : index
    %c0_10 = arith.constant 0 : index
    %12 = vector.load %arg5[%c0_9, %c0_10] : memref<1x128xf32, #tpu.memory_space<vmem>>, vector<1x128xf32>
    %13 = vector.broadcast %12 : vector<1x128xf32> to vector<8x128xf32>
    %14 = arith.addf %11, %13 : vector<8x128xf32>
    %cst_11 = arith.constant 0.000000e+00 : f32
    %15 = vector.broadcast %cst_11 : f32 to vector<8x128xf32>
    %16 = arith.maximumf %14, %15 : vector<8x128xf32>
    %17 = arith.truncf %16 : vector<8x128xf32> to vector<8x128xbf16>
    %c0_12 = arith.constant 0 : index
    %c0_13 = arith.constant 0 : index
    %18 = vector.load %arg6[%c0_12, %c0_13] : memref<128x128xbf16, #tpu.memory_space<vmem>>, vector<128x128xbf16>
    %cst_14 = arith.constant dense<0.000000e+00> : vector<8x128xf32>
    %19 = tpu.matmul %17, %18, %cst_14 {dimension_numbers = #tpu.dot_dimension_numbers<[1], [0], [0], [1], [0, 0, 1, 1], [], []>} : vector<8x128xbf16>, vector<128x128xbf16>, vector<8x128xf32> -> vector<8x128xf32>
    %c0_15 = arith.constant 0 : index
    %c0_16 = arith.constant 0 : index
    %20 = vector.load %arg7[%c0_15, %c0_16] : memref<1x128xf32, #tpu.memory_space<vmem>>, vector<1x128xf32>
    %21 = vector.broadcast %20 : vector<1x128xf32> to vector<8x128xf32>
    %22 = arith.addf %19, %21 : vector<8x128xf32>
    %23 = tpu.iota {dimensions = array<i32: 1>} : vector<8x128xi32>
    %c64_i32 = arith.constant 64 : i32
    %24 = vector.broadcast %c64_i32 : i32 to vector<8x128xi32>
    %25 = arith.cmpi slt, %23, %24 : vector<8x128xi32>
    %26 = math.exp %22 : vector<8x128xf32>
    %27 = arith.select %25, %22, %26 : vector<8x128xi1>, vector<8x128xf32>
    %c0_17 = arith.constant 0 : index
    %c0_18 = arith.constant 0 : index
    %28 = vector.load %arg8[%c0_17, %c0_18] : memref<8x128xf32, #tpu.memory_space<vmem>>, vector<8x128xf32>
    tpu.vector_store %arg8[%c0_17, %c0_18], %27 {strides = array<i32>} : memref<8x128xf32, #tpu.memory_space<vmem>>, vector<8x128xf32>,
    return
  }
  func.func @transform_0(%arg0: i32) -> (i32, i32) {
    %c0_i32 = arith.constant 0 : i32
    %c0_i32_0 = arith.constant 0 : i32
    return %arg0, %c0_i32 : i32, i32
  }
  func.func @transform_1(%arg0: i32) -> (i32, i32) {
    %c0_i32 = arith.constant 0 : i32
    %c0_i32_0 = arith.constant 0 : i32
    %c0_i32_1 = arith.constant 0 : i32
    return %c0_i32, %c0_i32_0 : i32, i32
  }
  func.func @transform_2(%arg0: i32) -> (i32, i32) {
    %c0_i32 = arith.constant 0 : i32
    %c0_i32_0 = arith.constant 0 : i32
    %c0_i32_1 = arith.constant 0 : i32
    return %c0_i32, %c0_i32_0 : i32, i32
  }
  func.func @transform_3(%arg0: i32) -> (i32, i32) {
    %c0_i32 = arith.constant 0 : i32
    %c0_i32_0 = arith.constant 0 : i32
    %c0_i32_1 = arith.constant 0 : i32
    return %c0_i32, %c0_i32_0 : i32, i32
  }
  func.func @transform_4(%arg0: i32) -> (i32, i32) {
    %c0_i32 = arith.constant 0 : i32
    %c0_i32_0 = arith.constant 0 : i32
    %c0_i32_1 = arith.constant 0 : i32
    return %c0_i32, %c0_i32_0 : i32, i32
  }
  func.func @transform_5(%arg0: i32) -> (i32, i32) {
    %c0_i32 = arith.constant 0 : i32
    %c0_i32_0 = arith.constant 0 : i32
    %c0_i32_1 = arith.constant 0 : i32
    return %c0_i32, %c0_i32_0 : i32, i32
  }
  func.func @transform_6(%arg0: i32) -> (i32, i32) {
    %c0_i32 = arith.constant 0 : i32
    %c0_i32_0 = arith.constant 0 : i32
    %c0_i32_1 = arith.constant 0 : i32
    return %c0_i32, %c0_i32_0 : i32, i32
  }
  func.func @transform_7(%arg0: i32) -> (i32, i32) {
    %c0_i32 = arith.constant 0 : i32
    %c0_i32_0 = arith.constant 0 : i32
    return %arg0, %c0_i32 : i32, i32
  }
}

</mosaic_0001>

<bundles_post_ra>
// kernel: encoder_forward.1
= control target key start
LH: loop header
LB: loop body
LE: loop exit
PB: predicated region body
PF: predicated region fallthrough
CT: control target
= control target key end

     0   :  { %12 = vsyncpa [#allocation3], 0  ;;  %s1307_s0 = inlined_call_operand.hbm [shape: f32[16,32], index: 0, kind: input, shape index: {}]   ;;  %s1308_s1 = inlined_call_operand.hbm [shape: bf16[32,128], index: 1, kind: input, shape index: {}]   ;;  %s1309_s2 = inlined_call_operand.vmem [shape: f32[1,128], index: 2, kind: input, shape index: {}]   ;;  %s1310_s3 = inlined_call_operand.hbm [shape: bf16[128,128], index: 3, kind: input, shape index: {}]   ;;  %s1311_s4 = inlined_call_operand.vmem [shape: f32[1,128], index: 4, kind: input, shape index: {}]   ;;  %s1312_s5 = inlined_call_operand.hbm [shape: bf16[128,128], index: 5, kind: input, shape index: {}]   ;;  %s1313_s6 = inlined_call_operand.vmem [shape: f32[1,128], index: 6, kind: input, shape index: {}]   ;;  %s1314_s7 = inlined_call_operand.vmem [shape: f32[16,128], index: 7, kind: output, shape index: {}]  }
   0x1   :  { %14 = vsyncpa [#allocation3 + $0x1], 0 }
   0x2   :  { %15 = vsyncpa [#allocation5], 0 }
   0x3   :  { %16 = vsyncpa [#allocation8], 0  ;;  %s1134_s24 = smov 0   ;;  %s1136_s25 = smov 0  }
   0x4   :  { %s1138_s26 = smov 0   ;;  %s1140_s27 = smov 0  }
   0x5 LB: > { %s1153_s28 = sadd.s32 4294967295, %s1084_s27   ;;  %p42_p0 = scmp.ne.s32.totalorder %s1076_s25, %s1072_s24  ;;  %s1084_s27 = sphi %s1140_s27, %s1331_s27   ;;  %s1080_s26 = sphi %s1138_s26, %s1330_s26   ;;  %s1076_s25 = sphi %s1136_s25, %s1329_s25   ;;  %s1072_s24 = sphi %s1134_s24, %s1328_s24  }
   0x6   : > { %p1315_p1 = scmp.eq.s32.totalorder %s1153_s28, 0  ;;  %p736_p2 = scmp.ge.s32.totalorder %s1084_s27, 1 }
   0x7   : > { %p205_p3 = scmp.lt.s32.totalorder %s1084_s27, 3  ;;  %s1086_s8 = smov [#allocation4]  }
   0x8   : > { %p1161_p4 = por %p1315_p1, %p42_p0  ;;  %s217_s9 = sshll.u32 %s1086_s8, 4  ;;  %s218_s9 = int_to_ptr.vmem [resolvable:$true] %s217_s9 }
   0x9   : > { %p1165_p5 = pnand %p736_p2, %p205_p3  ;;  %s1087_s11 = smov [#allocation6]  }
   0xa   : > { %s1318_s29 = scalar_select %p1161_p4, 1, 0 }
   0xb   : > { %s1319_s30 = scalar_select %p1165_p5, 1, 0 }
   0xc   : > { %p856_p6 = pneg %p1165_p5  ;;  %s233_s12 = sshll.u32 %s1087_s11, 4  ;;  %s234_s12 = int_to_ptr.vmem [resolvable:$true] %s233_s12 }
   0xd   : > { %s1088_s13 = smov [#allocation7]   ;;  %s947_s15 = scalar_lea.vmem %s218_s9, 256 }
   0xe   : > { %p1173_p7 = pnand %p856_p6, %p1315_p1  ;;  %s249_s14 = sshll.u32 %s1088_s13, 4  ;;  %s250_s14 = int_to_ptr.vmem [resolvable:$true] %s249_s14 }
   0xf   : > { %p948_p9 = scmp.ne.s32.totalorder %s218_s9, %s947_s15  ;;  %p955_p12 = scmp.lt.s32.totalorder %s218_s9, %s218_s9 }
  0x10   : > { %p938_p8 = pneg %p1173_p7  ;;  %p956_p13 = scmp.lt.s32.totalorder %s947_s15, %s947_s15 }
  0x12   : > { %p950_p10 = pnand %p948_p9, %p938_p8  ;;  %p957_p0 = por %p956_p13, %p955_p12 }
  0x14   : > { %p951_p11 = pneg %p950_p10 }
  0x16   : > { %p958_p2 = pnand %p957_p0, %p951_p11 }
  0x18   : > { %961 = shalt.err (!%p958_p2)
}
  0x19   : > { %s1089_s16 = smov 64   ;;  %s1090_s17 = smov 4  }
  0x1a   : > { %859 = dma.hbm_to_vmem [thread:$0]  (!%p1173_p7), %s1308_s1, 256, %s218_s9, [#allocation5], %s1089_s16, %s1089_s16, %s1090_s17  }
  0x1b   : > { %s973_s20 = scalar_lea.vmem %s234_s12, 1024  ;;  %p981_p10 = scmp.lt.s32.totalorder %s234_s12, %s234_s12 }
  0x1c   : > { %p974_p3 = scmp.ne.s32.totalorder %s234_s12, %s973_s20  ;;  %p982_p1 = scmp.lt.s32.totalorder %s973_s20, %s973_s20 }
  0x1e   : > { %p976_p6 = pnand %p974_p3, %p938_p8  ;;  %p983_p12 = por %p982_p1, %p981_p10 }
  0x20   : > { %p977_p9 = pneg %p976_p6 }
  0x22   : > { %p984_p11 = pnand %p983_p12, %p977_p9 }
  0x24   : > { %987 = shalt.err (!%p984_p11)
}
  0x25   : > { %862 = dma.hbm_to_vmem [thread:$0]  (!%p1173_p7), %s1310_s3, 1024, %s234_s12, [#allocation5], %s1089_s16, %s1089_s16, %s1090_s17  }
  0x26   : > { %s999_s23 = scalar_lea.vmem %s250_s14, 1024  ;;  %p1007_p3 = scmp.lt.s32.totalorder %s250_s14, %s250_s14 }
  0x27   : > { %p1000_p13 = scmp.ne.s32.totalorder %s250_s14, %s999_s23  ;;  %p1008_p6 = scmp.lt.s32.totalorder %s999_s23, %s999_s23 }
  0x29   : > { %p1002_p0 = pnand %p1000_p13, %p938_p8  ;;  %p1009_p4 = por %p1008_p6, %p1007_p3 }
  0x2b   : > { %p1003_p2 = pneg %p1002_p0 }
  0x2d   : > { %p1010_p1 = pnand %p1009_p4, %p1003_p2 }
  0x2f   : > { %1013 = shalt.err (!%p1010_p1)
}
  0x30   : > { %865 = dma.hbm_to_vmem [thread:$0]  (!%p1173_p7), %s1312_s5, 1024, %s250_s14, [#allocation8], %s1089_s16, %s1089_s16, %s1090_s17  }
  0x31   : > { %s1204_s9 = sadd.s32 1, %s1084_s27   ;;  %s29_s12 = sadd.s32 1, %s1080_s26 }
  0x32   : > { %s26_s11 = ssub.s32 %s1084_s27, %s1204_s9  ;;  %p36_p8 = scmp.ne.s32.totalorder %s1080_s26, %s1076_s25 }
  0x33   : > { %p27_p4 = scmp.eq.s32.totalorder %s26_s11, 0  ;;  %p37_p9 = scmp.eq.s32.totalorder %s1084_s27, 0 }
  0x34   : > { %p873_p10 = scmp.lt.s32.totalorder %s1084_s27, 2  ;;  %s266_s13 = sand.u32 1, %s1080_s26  }
  0x35   : > { %s1214_s10 = scalar_select %p27_p4, %s1080_s26, %s29_s12  }
  0x36   : > { %p38_p12 = por %p37_p9, %p36_p8  ;;  %s741_s15 = sshll.u32 %s266_s13, 3 }
  0x37   : > { %s742_s18 = sshll.u32 %s1084_s27, 7  ;;  %s270_s14 = scalar_lea.vmem [#allocation2], %s741_s15 }
  0x38   : > { %s1221_s21 = scalar_lea.hbm %s1307_s0, %s742_s18  ;;  %s277_s16 = sshll.u32 %s270_s14, 4  ;;  %s278_s16 = int_to_ptr.vmem [resolvable:$true] %s277_s16 }
  0x39   : > { %p1223_p7 = pnand %p873_p10, %p38_p12  ;;  %s267_s22 = scalar_lea.sflag [#allocation3], %s266_s13 }
  0x3a   : > { %s1014_s23 = scalar_lea.hbm %s1221_s21, 128  ;;  %s1019_s8 = scalar_lea.hbm %s1307_s0, 256 }
  0x3b   : > { %p1015_p11 = scmp.ne.s32.totalorder %s1221_s21, %s1014_s23  ;;  %p1016_p13 = pneg %p1223_p7 }
  0x3c   : > { %p1020_p3 = scmp.lt.s32.totalorder %s1221_s21, %s1307_s0  ;;  %p1021_p6 = scmp.lt.s32.totalorder %s1019_s8, %s1014_s23 }
  0x3d   : > { %p1017_p0 = pnand %p1016_p13, %p1015_p11 }
  0x3e   : > { %p1022_p1 = por %p1021_p6, %p1020_p3 }
  0x3f   : > { %p1018_p2 = pneg %p1017_p0 }
  0x41   : > { %p1023_p4 = pnand %p1022_p1, %p1018_p2 }
  0x43   : > { %1026 = shalt.err (!%p1023_p4)
}
  0x44   : > { %s1027_s15 = scalar_lea.vmem %s278_s16, 128  ;;  %s1091_s13 = smov [#allocation2]  }
  0x45   : > { %p1028_p8 = scmp.ne.s32.totalorder %s278_s16, %s1027_s15  ;;  %s1032_s18 = sshll.u32 %s1091_s13, 4  ;;  %s1033_s18 = int_to_ptr.vmem [resolvable:$false] %s1032_s18 }
  0x46   : > { %s1034_s19 = scalar_lea.vmem %s1033_s18, 256  ;;  %p1035_p12 = scmp.lt.s32.totalorder %s278_s16, %s1033_s18 }
  0x47   : > { %p1030_p9 = pnand %p1028_p8, %p1016_p13  ;;  %p1036_p11 = scmp.lt.s32.totalorder %s1034_s19, %s1027_s15 }
  0x49   : > { %p1031_p10 = pneg %p1030_p9  ;;  %p1037_p0 = por %p1036_p11, %p1035_p12 }
  0x4b   : > { %p1038_p5 = pnand %p1037_p0, %p1031_p10 }
  0x4d   : > { %1041 = shalt.err (!%p1038_p5)
}
  0x4e   : > { %869 = dma.hbm_to_vmem [thread:$0]  (!%p1223_p7), %s1221_s21, 128, %s278_s16, %s267_s22  }
  0x4f   : > { %p1322_p2 = scmp.ne.s32.totalorder %s1319_s30, 0 }
  0x50   : > { %s288_s20 = sand.u32 (!%p1322_p2), 1, %s1076_s25   ;;  %p1323_p13 = scmp.ne.s32.totalorder (!%p1322_p2), %s1318_s29, 0 }
  0x51   : > { %286 = sbr.rel (%p1322_p2) target bundleno = 715 (0x2cb), region = 48  ;;  %s744_s14 = sshll.u32 (!%p1322_p2), %s288_s20, 3 }
  0x52   : > { %s289_s23 = scalar_lea.sflag (!%p1322_p2), [#allocation3], %s288_s20  ;;  %s292_s27 = scalar_lea.vmem (!%p1322_p2), [#allocation2], %s744_s14 }
  0x56   : > { %1059 = dma.done.wait (%p1323_p13), %s289_s23, 128  }
  0x57   : > { %1061 = vsyncadd (%p1323_p13), %s289_s23, 4294967168  ;;  %p1324_p5 = scmp.eq.s32.totalorder %s1153_s28, 0 }
  0x59   : > { %1063 = dma.done.wait (%p1324_p5), [#allocation5], 1280   ;;  %p1325_p3 = pmov %p1324_p5 }
  0x5b   : > { %1065 = vsyncadd (%p1325_p3), [#allocation5], 4294966016  ;;  %p1326_p7 = pmov %p1325_p3 }
  0x5c   : > { %p1327_p6 = pmov %p1325_p3 }
  0x5d   : > { %1067 = dma.done.wait (%p1326_p7), [#allocation8], 1024  }
  0x5e   : > { %1069 = vsyncadd (%p1327_p6), [#allocation8], 4294966272  ;;  %v1092_v0 = vmov 0.0   ;;  %vm1093_vm0 = vmmov 0   ;;  %v916_v1 = vld [vmem:[#allocation4 + $0x8] sm:$0xff]   ;;  %v917_v2 = vld [vmem:[#allocation4] sm:$0xff]   ;;  %v634_v44 = vlaneseq }
  0x5f   : > { %794 = vmatprep.subr.bf16.mxu0 %v1092_v0  ;;  %798 = vmatprep.mubr.msk.bf16.mxu0 %vm1093_vm0, %v1092_v0  ;;  %v339_v3 = vld [vmem:[%s292_s27] sm:$0xff]  ;;  %v918_v4 = vld [vmem:[#allocation6 + $0x38] sm:$0xff]   ;;  %v919_v6 = vld [vmem:[#allocation6 + $0x30] sm:$0xff]   ;;  %vm364_vm1 = vcmask 261120   ;;  %p334_p1 = scmp.lt.s32.totalorder %s1153_s28, 1 }
  0x60   : > { %802 = vmatprep.subr.bf16.mxu1 %v1092_v0  ;;  %818 = vmatprep.mubr.msk.bf16.mxu1 %vm1093_vm0, %v1092_v0  ;;  %v340_v5 = vpack.c.bf16 %v339_v3, %v339_v3  ;;  %v920_v7 = vld [vmem:[#allocation6 + $0x28] sm:$0xff]   ;;  %v921_v8 = vld [vmem:[#allocation6 + $0x20] sm:$0xff]   ;;  %v922_v9 = vld [vmem:[#allocation6 + $0x18] sm:$0xff]   ;;  %v635_v45 = vand.u32 127, %v634_v44 }
  0x61   : > { %795 = vmatpush3.bf16.msra.mxu0 %v916_v1  ;;  %803 = vmatpush3.bf16.msra.mxu1 %v918_v4  ;;  %v923_v10 = vld [vmem:[#allocation6 + $0x10] sm:$0xff]   ;;  %v924_v11 = vld [vmem:[#allocation6 + $0x8] sm:$0xff]   ;;  %v925_v12 = vld [vmem:[#allocation6] sm:$0xff]   ;;  %s1333_s28 = smov (!%p334_p1, %s1153_s28), 1 }
  0x62   : > { %796 = vmatprep.subr.bf16.mxu0 %v1092_v0  ;;  %804 = vmatprep.subr.bf16.mxu1 %v1092_v0  ;;  %v926_v13 = vld [vmem:[#allocation7 + $0x38] sm:$0xff]   ;;  %v927_v14 = vld [vmem:[#allocation7 + $0x30] sm:$0xff]   ;;  %v928_v15 = vld [vmem:[#allocation7 + $0x28] sm:$0xff]   ;;  %s748_s24 = sshll.u32 %s1333_s28, 3  ;;  %vm636_vm2 = vcmp.lt.s32.totalorder %v635_v45, 64 }
  0x63   : > { %v929_v16 = vld [vmem:[#allocation7 + $0x20] sm:$0xff]   ;;  %v930_v17 = vld [vmem:[#allocation7 + $0x18] sm:$0xff]   ;;  %v931_v18 = vld [vmem:[#allocation7 + $0x10] sm:$0xff]   ;;  %s337_s12 = scalar_lea.vmem %s1314_s7, %s748_s24 }
  0x64   : > { %v749_v19 = vld [vmem:[%s1309_s2] ss:$0 sm:$0xff]  ;;  %v932_v27 = vld [vmem:[#allocation7 + $0x8] sm:$0xff]  }
  0x65   : > { %797 = vmatpush3.bf16.msra.mxu0 %v917_v2  ;;  %805 = vmatpush3.bf16.msra.mxu1 %v919_v6  ;;  %v933_v28 = vld [vmem:[#allocation7] sm:$0xff]  }
  0x66   : > { %822 = vmatprep.subr.bf16.mxu0 %v1092_v0  ;;  %806 = vmatprep.subr.bf16.mxu1 %v1092_v0  ;;  %v753_v29 = vld [vmem:[%s1311_s4] ss:$0 sm:$0xff] }
  0x67   : > { %v762_v37 = vld [vmem:[%s1313_s6] ss:$0 sm:$0xff] }
  0x68   : > { %799 = vmatmul.mubr.msk.bf16.vlgmr.msra.gmra.mxu0 %vm364_vm1, %v340_v5 }
  0x69   : > { %838 = vmatprep.mubr.msk.bf16.mxu0 %vm1093_vm0, %v1092_v0  ;;  %807 = vmatpush3.bf16.msra.mxu1 %v920_v7 }
  0x6a   : > { %808 = vmatprep.subr.bf16.mxu1 %v1092_v0  ;;  %823 = vmatpush3.bf16.msra.mxu0 %v926_v13 }
  0x6b   : > { %824 = vmatprep.subr.bf16.mxu0 %v1092_v0 }
  0x6d   : > { %809 = vmatpush3.bf16.msra.mxu1 %v921_v8 }
  0x6e   : > { %810 = vmatprep.subr.bf16.mxu1 %v1092_v0  ;;  %825 = vmatpush3.bf16.msra.mxu0 %v927_v14 }
  0x6f   : > { %826 = vmatprep.subr.bf16.mxu0 %v1092_v0 }
  0x71   : > { %811 = vmatpush3.bf16.msra.mxu1 %v922_v9 }
  0x72   : > { %812 = vmatprep.subr.bf16.mxu1 %v1092_v0  ;;  %827 = vmatpush3.bf16.msra.mxu0 %v928_v15 }
  0x73   : > { %828 = vmatprep.subr.bf16.mxu0 %v1092_v0 }
  0x75   : > { %813 = vmatpush3.bf16.msra.mxu1 %v923_v10 }
  0x76   : > { %814 = vmatprep.subr.bf16.mxu1 %v1092_v0  ;;  %829 = vmatpush3.bf16.msra.mxu0 %v929_v16 }
  0x77   : > { %830 = vmatprep.subr.bf16.mxu0 %v1092_v0 }
  0x79   : > { %815 = vmatpush3.bf16.msra.mxu1 %v924_v11 }
  0x7a   : > { %816 = vmatprep.subr.bf16.mxu1 %v1092_v0  ;;  %831 = vmatpush3.bf16.msra.mxu0 %v930_v17 }
  0x7b   : > { %832 = vmatprep.subr.bf16.mxu0 %v1092_v0 }
  0x7d   : > { %817 = vmatpush3.bf16.msra.mxu1 %v925_v12 }
  0x7e   : > { %833 = vmatpush3.bf16.msra.mxu0 %v931_v18 }
  0x7f   : > { %834 = vmatprep.subr.bf16.mxu0 %v1092_v0 }
  0x82   : > { %835 = vmatpush3.bf16.msra.mxu0 %v932_v27 }
  0x83   : > { %836 = vmatprep.subr.bf16.mxu0 %v1092_v0 }
  0x86   : > { %837 = vmatpush3.bf16.msra.mxu0 %v933_v28 }
 0x128   : > { %v402_v20 = vpop.f32.mrf.mxu0 }
 0x129   : > { %v403_v21 = vadd.f32 %v749_v19, %v402_v20 }
 0x12a   : > { %v800_v22 = vpop.f32.mrf.mxu0 }
 0x12b   : > { %v408_v23 = vmax.f32 %v403_v21, 0.0 }
 0x12c   : > { %v405_v24 = vpop.f32.mrf.mxu0 }
 0x12d   : > { %v409_v25 = vpack.c.bf16 %v408_v23, %v408_v23 }
 0x12e   : > { %v801_v26 = vpop.f32.mrf.mxu0 }
 0x12f   : > { %819 = vmatmul.mubr.bf16.vlgmr.msra.gmra.mxu1 %v409_v25 }
 0x1ef   : > { %v515_v30 = vpop.f32.mrf.mxu1 }
 0x1f0   : > { %v516_v31 = vadd.f32 %v753_v29, %v515_v30 }
 0x1f1   : > { %v820_v32 = vpop.f32.mrf.mxu1 }
 0x1f2   : > { %v521_v33 = vmax.f32 %v516_v31, 0.0 }
 0x1f3   : > { %v518_v34 = vpop.f32.mrf.mxu1 }
 0x1f4   : > { %v522_v35 = vpack.c.bf16 %v521_v33, %v521_v33 }
 0x1f5   : > { %v821_v36 = vpop.f32.mrf.mxu1 }
 0x1f6   : > { %839 = vmatmul.mubr.bf16.vlgmr.msra.gmra.mxu0 %v522_v35 }
 0x2b6   : > { %v628_v38 = vpop.f32.mrf.mxu0 }
 0x2b7   : > { %v629_v39 = vadd.f32 %v762_v37, %v628_v38 }
 0x2b8   : > { %v840_v40 = vpop.f32.mrf.mxu0 }
 0x2b9   : > { %v637_v41 = vmul.f32 1.442695, %v629_v39 }
 0x2ba   : > { %v631_v42 = vpop.f32.mrf.mxu0 }
 0x2bb   : > { %934 = vpow2.f32 %v637_v41 }
 0x2bc   : > { %v841_v43 = vpop.f32.mrf.mxu0 }
 0x2c8   : > { %v935_v46 = vpop.eup %934 }
 0x2c9   : > { %v639_v47 = vsel %vm636_vm2, %v629_v39, %v935_v46 }
 0x2ca   : > { %640 = vst [vmem:[%s337_s12] sm:$0xff] %v639_v47 }
 0x2cb PF: > { %p19_p4 = scmp.ge.s32.totalorder %s1204_s9, 4   ;;  %s1328_s24 = smov %s1076_s25 }
 0x2cc   : > { %s1329_s25 = smov %s1080_s26  ;;  %s1330_s26 = smov %s1214_s10 }
 0x2cd   : > { %s1331_s27 = smov %s1204_s9  ;;  %21 = sbr.rel (!%p19_p4) target bundleno = 5 (0x5), region = 100 }
 0x2d2   :  { %660 = vsyncpa [#allocation3], 1 }
 0x2d3   :  { %662 = vsyncpa [#allocation3 + $0x1], 1 }
 0x2d4   :  { %663 = vsyncpa [#allocation5], 1 }
 0x2d5   :  { %664 = vsyncpa [#allocation8], 1 }

</bundles_post_ra>
